<compile_context>
chip_gen: v5e
topology: v5e:2x2
jax: 0.10.0
libtpu: 0.0.40
codegen_flags: <defaults>
</compile_context>

<pallas_src>
import functools

import jax
import jax.numpy as jnp
from jax.experimental import pallas as pl
from jax.experimental.pallas import tpu as pltpu

BN_EPS = 1e-5


# ----------------------------------------------------------------------------
# Pass 1: h = x @ w1 (bf16 MXU, f32 acc) + per-tile sum / sum-of-squares
# ----------------------------------------------------------------------------
def _layer1_kernel(x_ref, w1_ref, h_ref, stats_ref):
    # Cast the f32 input tile to bf16 in VMEM (cheap VPU op hidden under the
    # MXU) — avoids a separate wrapper-side cast HLO and its HBM round-trip.
    x = x_ref[...].astype(jnp.bfloat16)
    h = jnp.dot(x, w1_ref[...], preferred_element_type=jnp.float32)  # (Bt,H) f32

    # Store the pre-BN activation in bf16: halves h's HBM traffic.
    h_ref[...] = h.astype(jnp.bfloat16)

    # Per-tile batch statistics via a plain axis-0 f32 reduction: cross-vreg
    # adds land on the VALU and the final sublane reduce on the XLU, both of
    # which are idle under the main MXU matmul — and the sums stay in true
    # f32 (an M=1 "ones" MXU dot would push h as weights and truncate to bf16).
    s1 = jnp.sum(h, axis=0, keepdims=True)        # (1, H)
    s2 = jnp.sum(h * h, axis=0, keepdims=True)    # (1, H)
    stats_ref[...] = jnp.concatenate([s1, s2], axis=0).reshape(1, 2, -1)


# ----------------------------------------------------------------------------
# Pass 2: in-kernel BN fold -> normalize -> ReLU -> bf16 matmul (padded w2)
# ----------------------------------------------------------------------------
def _layer2_kernel(h_ref, stats_ref, gamma_ref, beta_ref, w2_ref, b2_ref,
                   o_ref, *, inv_b):
    # Combine the per-tile statistics and derive the fused BN scale/shift in
    # kernel (a handful of (1,H)/(2,H) vregs; rsqrt goes to the EUP slot).
    # This removes the tiny XLA stat-combine ops between the two kernels.
    sums = stats_ref[0]                                   # (2, H) f32
    for t in range(1, stats_ref.shape[0]):                # static unroll, tiny
        sums = sums + stats_ref[t]
    mean = sums[0:1] * inv_b                              # (1, H)
    var = jnp.maximum(sums[1:2] * inv_b - mean * mean, 0.0)   # biased, clamped
    scale = gamma_ref[...] * jax.lax.rsqrt(var + BN_EPS)
    shift = beta_ref[...] - mean * scale

    # Normalize (one mul + one add), ReLU, bf16 for the MXU.
    h = h_ref[...].astype(jnp.float32) * scale + shift
    h = jnp.maximum(h, 0.0).astype(jnp.bfloat16)
    out = jnp.dot(h, w2_ref[...], preferred_element_type=jnp.float32)
    o_ref[...] = out + b2_ref[...]


def _pick_tile(batch, max_tile=512):
    # Prefer multiples of 16: bf16 packs (16,128) per vreg, so 8-row bf16
    # blocks would force partially-packed sublanes / masked stores.
    for t in (1024, 512, 256, 128, 64, 32, 16):
        if t <= max_tile and t <= batch and batch % t == 0:
            return t
    return batch  # full-extent block is always layout-legal


def prepare_params(params):
    """One-time conversion of module parameters into kernel-ready form.

    Hoisted out of the per-call path: the w1 bf16 cast and the lane-dense
    zero-pad of w2/b2 to a multiple of 128 output columns are done once and
    reused across projection calls.
    """
    H, out_dim = params["w2"].shape
    n_pad = max(128, ((out_dim + 127) // 128) * 128)
    w2p = jnp.zeros((H, n_pad), jnp.bfloat16).at[:, :out_dim].set(
        params["w2"].astype(jnp.bfloat16))
    b2p = jnp.zeros((1, n_pad), jnp.float32).at[:, :out_dim].set(
        params["b2"].reshape(1, -1).astype(jnp.float32))
    return {
        "w1": params["w1"].astype(jnp.bfloat16),
        "gamma": params["gamma"].reshape(1, -1).astype(jnp.float32),
        "beta": params["beta"].reshape(1, -1).astype(jnp.float32),
        "w2p": w2p,
        "b2p": b2p,
        "out_dim": out_dim,
    }


def projection_mlp(x, prep, *, max_block_b=512):
    """x: (B, in_dim) float32.  prep: output of prepare_params()."""
    B, in_dim = x.shape
    H = prep["w1"].shape[1]
    n_pad = prep["w2p"].shape[1]
    out_dim = prep["out_dim"]

    # VMEM note: default max_block_b=512 keeps the per-TC footprint
    # (x tile + w1 + bf16 h, double-buffered) comfortably under v7x's
    # 64 MiB/TC and v5e's scoped limit for typical in_dim/H; v6e users can
    # pass max_block_b=1024, v5e users with very large in_dim can drop to 256.
    bt = _pick_tile(B, max_block_b)
    nbt = B // bt

    cp = pltpu.CompilerParams(
        dimension_semantics=("parallel",),       # megacore shards the batch
        vmem_limit_bytes=48 * 1024 * 1024,       # explicit, below all chips' physical VMEM
    )

    h, stats = pl.pallas_call(
        _layer1_kernel,
        out_shape=(
            jax.ShapeDtypeStruct((B, H), jnp.bfloat16),      # pre-BN activations
            jax.ShapeDtypeStruct((nbt, 2, H), jnp.float32),  # per-tile [sum, sumsq]
        ),
        grid=(nbt,),
        in_specs=[
            pl.BlockSpec((bt, in_dim), lambda i: (i, 0)),
            pl.BlockSpec((in_dim, H), lambda i: (0, 0)),     # grid-invariant
        ],
        out_specs=(
            pl.BlockSpec((bt, H), lambda i: (i, 0)),
            pl.BlockSpec((1, 2, H), lambda i: (i, 0, 0)),
        ),
        compiler_params=cp,
    )(x, prep["w1"])

    kernel2 = functools.partial(_layer2_kernel, inv_b=1.0 / B)
    out_padded = pl.pallas_call(
        kernel2,
        out_shape=jax.ShapeDtypeStruct((B, n_pad), jnp.float32),
        grid=(nbt,),
        in_specs=[
            pl.BlockSpec((bt, H), lambda i: (i, 0)),
            pl.BlockSpec((nbt, 2, H), lambda i: (0, 0, 0)),  # grid-invariant, tiny
            pl.BlockSpec((1, H), lambda i: (0, 0)),
            pl.BlockSpec((1, H), lambda i: (0, 0)),
            pl.BlockSpec((H, n_pad), lambda i: (0, 0)),
            pl.BlockSpec((1, n_pad), lambda i: (0, 0)),
        ],
        out_specs=pl.BlockSpec((bt, n_pad), lambda i: (i, 0)),
        compiler_params=cp,
    )(h, stats, prep["gamma"], prep["beta"], prep["w2p"], prep["b2p"])

    return out_padded[:, :out_dim]


def init_params(key, in_dim, hidden_dim=1024, out_dim=64):
    """Synthetic init mirroring the module's parameter shapes.

    layer1's Linear bias is intentionally omitted: with training-mode
    BatchNorm directly after it, the bias is cancelled exactly by the mean
    subtraction, so carrying it would only add a wasted (B,H) VPU pass.
    """
    k1, k2, k3 = jax.random.split(key, 3)
    s1 = 1.0 / jnp.sqrt(in_dim)
    s2 = 1.0 / jnp.sqrt(hidden_dim)
    return {
        "w1": jax.random.uniform(k1, (in_dim, hidden_dim), jnp.float32, -s1, s1),
        "gamma": jnp.ones((hidden_dim,), jnp.float32),   # BN weight
        "beta": jnp.zeros((hidden_dim,), jnp.float32),   # BN bias
        "w2": jax.random.uniform(k2, (hidden_dim, out_dim), jnp.float32, -s2, s2),
        "b2": jax.random.uniform(k3, (out_dim,), jnp.float32, -s2, s2),
    }


def _reference(x, p):
    """Pure-JAX reference (same bf16-matmul / f32-accumulate recipe)."""
    h = jnp.dot(x.astype(jnp.bfloat16), p["w1"].astype(jnp.bfloat16),
                preferred_element_type=jnp.float32)
    mean = h.mean(0, keepdims=True)
    var = ((h - mean) ** 2).mean(0, keepdims=True)          # biased variance
    hn = (h - mean) * jax.lax.rsqrt(var + BN_EPS) * p["gamma"][None, :] \
        + p["beta"][None, :]
    hn = jnp.maximum(hn, 0.0)
    return jnp.dot(hn.astype(jnp.bfloat16), p["w2"].astype(jnp.bfloat16),
                   preferred_element_type=jnp.float32) + p["b2"][None, :]


if __name__ == "__main__":
    key = jax.random.PRNGKey(0)
    k_x, k_p = jax.random.split(key)

    # Small but non-trivial: 4 batch tiles (multi-tile stats combine) and an
    # out_dim below 128 so the padded, lane-dense layer-2 output is exercised.
    B, in_dim, hidden_dim, out_dim = 64, 128, 256, 64
    x = jax.random.normal(k_x, (B, in_dim), jnp.float32)
    params = init_params(k_p, in_dim, hidden_dim, out_dim)
    prep = prepare_params(params)

    out = jax.block_until_ready(projection_mlp(x, prep, max_block_b=16))
    ref = _reference(x, params)

    assert out.shape == (B, out_dim)
    max_err = float(jnp.abs(out - ref).max())
    assert jnp.allclose(out, ref, atol=2e-2, rtol=2e-2), max_err

    # TODO(synk): BatchNorm running_mean / running_var buffer updates (used in
    # eval mode) are not modeled; BN here always uses batch statistics.
    print("KERNEL_OK")
</pallas_src>

<mosaic_0001>
module attributes {stable_mosaic.version = 11 : i64} {
  func.func @_layer1_kernel(%arg0: i32, %arg1: memref<16x128xf32, #tpu.memory_space<vmem>>, %arg2: memref<128x256xbf16, #tpu.memory_space<vmem>>, %arg3: memref<16x256xbf16, #tpu.memory_space<vmem>>, %arg4: memref<1x2x256xf32, #tpu.memory_space<vmem>>) attributes {dimension_semantics = [#tpu.dimension_semantics<parallel>], iteration_bounds = array<i64: 4>, scalar_prefetch = 0 : i64, scratch_operands = 0 : i64, tpu.core_type = #tpu.core_type<tc>, window_params = [{transform_indices = @transform_0, window_bounds = array<i64: 16, 128>}, {pipeline_mode = #tpu.pipeline_mode<synchronous>, transform_indices = @transform_1, window_bounds = array<i64: 128, 256>}, {transform_indices = @transform_2, window_bounds = array<i64: 16, 256>}, {transform_indices = @transform_3, window_bounds = array<i64: 1, 2, 256>}]} {
    %c0 = arith.constant 0 : index
    %c0_0 = arith.constant 0 : index
    %0 = vector.load %arg1[%c0, %c0_0] : memref<16x128xf32, #tpu.memory_space<vmem>>, vector<16x128xf32>
    %1 = arith.truncf %0 : vector<16x128xf32> to vector<16x128xbf16>
    %c0_1 = arith.constant 0 : index
    %c0_2 = arith.constant 0 : index
    %2 = vector.load %arg2[%c0_1, %c0_2] : memref<128x256xbf16, #tpu.memory_space<vmem>>, vector<128x256xbf16>
    %cst = arith.constant dense<0.000000e+00> : vector<16x256xf32>
    %3 = tpu.matmul %1, %2, %cst {dimension_numbers = #tpu.dot_dimension_numbers<[1], [0], [0], [1], [0, 0, 1, 1], [], []>} : vector<16x128xbf16>, vector<128x256xbf16>, vector<16x256xf32> -> vector<16x256xf32>
    %4 = arith.truncf %3 : vector<16x256xf32> to vector<16x256xbf16>
    %c0_3 = arith.constant 0 : index
    %c0_4 = arith.constant 0 : index
    %5 = vector.load %arg3[%c0_3, %c0_4] : memref<16x256xbf16, #tpu.memory_space<vmem>>, vector<16x256xbf16>
    tpu.vector_store %arg3[%c0_3, %c0_4], %4 {strides = array<i32>} : memref<16x256xbf16, #tpu.memory_space<vmem>>, vector<16x256xbf16>,
    %cst_5 = arith.constant dense<0.000000e+00> : vector<256xf32>
    %6 = vector.multi_reduction <add>, %3, %cst_5 [0] : vector<16x256xf32> to vector<256xf32>
    %7 = vector.shape_cast %6 : vector<256xf32> to vector<1x256xf32>
    %8 = arith.mulf %3, %3 : vector<16x256xf32>
    %cst_6 = arith.constant dense<0.000000e+00> : vector<256xf32>
    %9 = vector.multi_reduction <add>, %8, %cst_6 [0] : vector<16x256xf32> to vector<256xf32>
    %10 = vector.shape_cast %9 : vector<256xf32> to vector<1x256xf32>
    %11 = tpu.concatenate %7, %10 in 0 : vector<1x256xf32>, vector<1x256xf32> -> vector<2x256xf32>
    %12 = vector.shape_cast %11 : vector<2x256xf32> to vector<1x2x256xf32>
    %c0_7 = arith.constant 0 : index
    %c0_8 = arith.constant 0 : index
    %c0_9 = arith.constant 0 : index
    %13 = vector.load %arg4[%c0_7, %c0_8, %c0_9] : memref<1x2x256xf32, #tpu.memory_space<vmem>>, vector<1x2x256xf32>
    tpu.vector_store %arg4[%c0_7, %c0_8, %c0_9], %12 {strides = array<i32>} : memref<1x2x256xf32, #tpu.memory_space<vmem>>, vector<1x2x256xf32>,
    return
  }
  func.func @transform_0(%arg0: i32) -> (i32, i32) {
    %c0_i32 = arith.constant 0 : i32
    %c0_i32_0 = arith.constant 0 : i32
    return %arg0, %c0_i32 : i32, i32
  }
  func.func @transform_1(%arg0: i32) -> (i32, i32) {
    %c0_i32 = arith.constant 0 : i32
    %c0_i32_0 = arith.constant 0 : i32
    %c0_i32_1 = arith.constant 0 : i32
    return %c0_i32, %c0_i32_0 : i32, i32
  }
  func.func @transform_2(%arg0: i32) -> (i32, i32) {
    %c0_i32 = arith.constant 0 : i32
    %c0_i32_0 = arith.constant 0 : i32
    return %arg0, %c0_i32 : i32, i32
  }
  func.func @transform_3(%arg0: i32) -> (i32, i32, i32) {
    %c0_i32 = arith.constant 0 : i32
    %c0_i32_0 = arith.constant 0 : i32
    %c0_i32_1 = arith.constant 0 : i32
    return %arg0, %c0_i32, %c0_i32_0 : i32, i32, i32
  }
}

</mosaic_0001>

<bundles_post_ra>
// kernel: tpu_custom_call.1
= control target key start
LH: loop header
LB: loop body
LE: loop exit
PB: predicated region body
PF: predicated region fallthrough
CT: control target
= control target key end

     0   :  { %9 = vsyncpa [#allocation3], 0  ;;  %s1076_s0 = inlined_call_operand.hbm [shape: f32[64,128], index: 0, kind: input, shape index: {}]   ;;  %s1077_s1 = inlined_call_operand.hbm [shape: bf16[128,256], index: 1, kind: input, shape index: {}]   ;;  %s1078_s2 = inlined_call_operand.hbm [shape: bf16[64,256], index: 2, kind: output, shape index: {0}]   ;;  %s1079_s3 = inlined_call_operand.hbm [shape: f32[4,2,256], index: 3, kind: output, shape index: {1}]  }
   0x1   :  { %11 = vsyncpa [#allocation3 + $0x1], 0 }
   0x2   :  { %12 = vsyncpa [#allocation6], 0 }
   0x3   :  { %13 = vsyncpa [#allocation4], 0 }
   0x4   :  { %15 = vsyncpa [#allocation4 + $0x1], 0 }
   0x5   :  { %16 = vsyncpa [#allocation9], 0 }
   0x6   :  { %18 = vsyncpa [#allocation9 + $0x1], 0  ;;  %s907_s12 = smov 0   ;;  %s909_s13 = smov 0  }
   0x7   :  { %s911_s14 = smov 0   ;;  %s913_s15 = smov 0  }
   0x8 LB: > { %s928_s16 = sadd.s32 4294967295, %s880_s15   ;;  %s547_s17 = sadd.s32 4294967294, %s880_s15   ;;  %s880_s15 = sphi %s913_s15, %s1088_s15   ;;  %s876_s14 = sphi %s911_s14, %s1087_s14   ;;  %s872_s13 = sphi %s909_s13, %s1086_s13   ;;  %s868_s12 = sphi %s907_s12, %s1085_s12  }
   0x9   : > { %p44_p0 = scmp.ne.s32.totalorder %s872_s13, %s868_s12  ;;  %p45_p1 = scmp.eq.s32.totalorder %s928_s16, 0 }
   0xa   : > { %p89_p2 = scmp.eq.s32.totalorder %s928_s16, 3  ;;  %p95_p3 = scmp.eq.s32.totalorder %s547_s17, 3 }
   0xb   : > { %p937_p4 = por %p45_p1, %p44_p0  ;;  %p548_p5 = scmp.ge.s32.totalorder %s880_s15, 1 }
   0xc   : > { %p942_p6 = por %p95_p3, %p44_p0  ;;  %p128_p7 = scmp.lt.s32.totalorder %s880_s15, 5 }
   0xd   : > { %s139_s22 = sshll.u32 %s1077_s1, 4  ;;  %s882_s24 = smov [#allocation5]   ;;  %s140_s22 = int_to_ptr.hbm [resolvable:$true] %s139_s22 }
   0xe   : > { %p950_p8 = pnand %p548_p5, %p128_p7  ;;  %s141_s25 = sshll.u32 %s882_s24, 4  ;;  %s142_s25 = int_to_ptr.vmem [resolvable:$true] %s141_s25 }
   0xf   : > { %s959_s26 = sadd.s32 1, %s880_s15   ;;  %s883_s27 = smov 128  }
  0x10   : > { %p662_p9 = pneg %p950_p8  ;;  %s884_s28 = smov 8  }
  0x11   : > { %s28_s29 = ssub.s32 %s880_s15, %s959_s26  ;;  %s31_s30 = sadd.s32 1, %s876_s14 }
  0x12   : > { %p663_p10 = pnand %p662_p9, %p45_p1  ;;  %p29_p11 = scmp.eq.s32.totalorder %s28_s29, 0 }
  0x13   : > { %p38_p12 = scmp.ne.s32.totalorder %s876_s14, %s872_s13  ;;  %p39_p13 = scmp.eq.s32.totalorder %s880_s15, 0 }
  0x14   : > { %665 = dma.hbm_to_vmem [thread:$0]  (!%p663_p10), %s140_s22, 2048, %s142_s25, [#allocation6], %s883_s27, %s883_s27, %s884_s28  }
  0x15   : > { %s971_s4 = scalar_select %p29_p11, %s876_s14, %s31_s30  }
  0x16   : > { %p975_p0 = por %p89_p2, %p38_p12  ;;  %p678_p3 = scmp.lt.s32.totalorder %s880_s15, 4 }
  0x17   : > { %s155_s6 = sand.u32 1, %s876_s14   ;;  %s632_s7 = sshll.u32 %s880_s15, 4 }
  0x18   : > { %p40_p5 = por %p39_p13, %p38_p12  ;;  %s551_s8 = sshll.u32 %s155_s6, 4 }
  0x19   : > { %s164_s11 = scalar_lea.hbm %s1076_s0, %s632_s7  ;;  %s159_s20 = scalar_lea.vmem [#allocation2], %s551_s8 }
  0x1a   : > { %s165_s17 = sshll.u32 %s164_s11, 4  ;;  %s167_s21 = sshll.u32 %s159_s20, 4  ;;  %s166_s17 = int_to_ptr.hbm [resolvable:$true] %s165_s17  ;;  %s168_s21 = int_to_ptr.vmem [resolvable:$true] %s167_s21 }
  0x1b   : > { %p985_p7 = pnand %p678_p3, %p40_p5  ;;  %s156_s24 = scalar_lea.sflag [#allocation3], %s155_s6 }
  0x1c   : > { %s748_s25 = sshra.s32 %s166_s17, 4  ;;  %s755_s8 = scalar_lea.hbm %s1076_s0, 64  ;;  %s749_s25 = int_to_ptr.hbm [resolvable:$true] %s748_s25 }
  0x1d   : > { %s750_s29 = scalar_lea.hbm %s749_s25, 16  ;;  %p752_p9 = pneg %p985_p7 }
  0x1e   : > { %p751_p2 = scmp.ne.s32.totalorder %s749_s25, %s750_s29  ;;  %p756_p12 = scmp.lt.s32.totalorder %s749_s25, %s1076_s0 }
  0x1f   : > { %p757_p13 = scmp.lt.s32.totalorder %s755_s8, %s750_s29 }
  0x20   : > { %p753_p10 = pnand %p752_p9, %p751_p2 }
  0x21   : > { %p758_p3 = por %p757_p13, %p756_p12 }
  0x22   : > { %p754_p11 = pneg %p753_p10 }
  0x24   : > { %p759_p5 = pnand %p758_p3, %p754_p11 }
  0x26   : > { %762 = shalt.err (!%p759_p5)
}
  0x27   : > { %669 = dma.hbm_to_vmem [thread:$0]  (!%p985_p7), %s166_s17, 256, %s168_s21, %s156_s24, %s883_s27, %s883_s27, %s884_s28  }
  0x28   : > { %179 = sbr.rel (%p950_p8) target bundleno = 241 (0xf1), region = 28  ;;  %s1005_s6 = sand.u32 (!%p950_p8), 1, %s872_s13  }
  0x29   : > { %s555_s11 = sshll.u32 (!%p950_p8), %s1005_s6, 4  ;;  %s182_s20 = scalar_lea.sflag (!%p950_p8), [#allocation3], %s1005_s6 }
  0x2a   : > { %s1011_s25 = scalar_lea.vmem (!%p950_p8), [#allocation2], %s555_s11 }
  0x2d   : > { %851 = dma.done.wait (%p937_p4), %s182_s20, 256  }
  0x2e   : > { %853 = vsyncadd (%p937_p4), %s182_s20, 4294967040 }
  0x2f   : > { %855 = dma.done.wait (%p45_p1), [#allocation6], 2048  }
  0x30   : > { %857 = vsyncadd (%p45_p1), [#allocation6], 4294965248  ;;  %v617_v0 = vld [vmem:[#allocation5 + $0x70] sm:$0xf]  ;;  %v648_v1 = vld [vmem:[#allocation5 + $0x74] sm:$0xf0] }
  0x31   : > { %v647_v2 = vld [vmem:[#allocation5 + $0x74] sm:$0xf]  ;;  %v618_v3 = vor.u32 %v648_v1, %v617_v0  ;;  %v619_v4 = vld [vmem:[#allocation5 + $0x78] sm:$0xf0]  ;;  %v609_v5 = vld [vmem:[#allocation5 + $0x60] sm:$0xf] }
  0x32   : > { %v646_v6 = vld [vmem:[#allocation5 + $0x64] sm:$0xf0]  ;;  %v622_v7 = vor.u32 %v647_v2, %v619_v4  ;;  %v645_v8 = vld [vmem:[#allocation5 + $0x64] sm:$0xf]  ;;  %v611_v9 = vld [vmem:[#allocation5 + $0x68] sm:$0xf0] }
  0x33   : > { %320 = vmatpush.bf16.msra.mxu0 %v618_v3  ;;  %v610_v10 = vor.u32 %v646_v6, %v609_v5  ;;  %v614_v11 = vor.u32 %v645_v8, %v611_v9  ;;  %v601_v12 = vld [vmem:[#allocation5 + $0x50] sm:$0xf]  ;;  %v644_v13 = vld [vmem:[#allocation5 + $0x54] sm:$0xf0]  ;;  %v643_v14 = vld [vmem:[#allocation5 + $0x54] sm:$0xf] }
  0x34   : > { %334 = vmatpush.bf16.msra.mxu1 %v622_v7  ;;  %v603_v15 = vld [vmem:[#allocation5 + $0x58] sm:$0xf0]  ;;  %v602_v16 = vor.u32 %v644_v13, %v601_v12  ;;  %v593_v18 = vld [vmem:[#allocation5 + $0x40] sm:$0xf]  ;;  %v642_v19 = vld [vmem:[#allocation5 + $0x44] sm:$0xf0] }
  0x35   : > { %v606_v17 = vor.u32 %v643_v14, %v603_v15  ;;  %v641_v20 = vld [vmem:[#allocation5 + $0x44] sm:$0xf]  ;;  %v595_v21 = vld [vmem:[#allocation5 + $0x48] sm:$0xf0]  ;;  %v594_v22 = vor.u32 %v642_v19, %v593_v18  ;;  %v585_v24 = vld [vmem:[#allocation5 + $0x30] sm:$0xf] }
  0x36   : > { %v598_v23 = vor.u32 %v641_v20, %v595_v21  ;;  %v640_v25 = vld [vmem:[#allocation5 + $0x34] sm:$0xf0]  ;;  %v639_v26 = vld [vmem:[#allocation5 + $0x34] sm:$0xf]  ;;  %v587_v27 = vld [vmem:[#allocation5 + $0x38] sm:$0xf0] }
  0x37   : > { %321 = vmatpush.bf16.msra.mxu0 %v610_v10  ;;  %v586_v28 = vor.u32 %v640_v25, %v585_v24  ;;  %v590_v29 = vor.u32 %v639_v26, %v587_v27  ;;  %v577_v30 = vld [vmem:[#allocation5 + $0x20] sm:$0xf]  ;;  %v638_v31 = vld [vmem:[#allocation5 + $0x24] sm:$0xf0]  ;;  %v637_v32 = vld [vmem:[#allocation5 + $0x24] sm:$0xf] }
  0x38   : > { %335 = vmatpush.bf16.msra.mxu1 %v614_v11  ;;  %v579_v33 = vld [vmem:[#allocation5 + $0x28] sm:$0xf0]  ;;  %v578_v34 = vor.u32 %v638_v31, %v577_v30  ;;  %v569_v36 = vld [vmem:[#allocation5 + $0x10] sm:$0xf]  ;;  %v636_v37 = vld [vmem:[#allocation5 + $0x14] sm:$0xf0] }
  0x39   : > { %v582_v35 = vor.u32 %v637_v32, %v579_v33  ;;  %v635_v38 = vld [vmem:[#allocation5 + $0x14] sm:$0xf]  ;;  %v571_v39 = vld [vmem:[#allocation5 + $0x18] sm:$0xf0]  ;;  %v570_v40 = vor.u32 %v636_v37, %v569_v36  ;;  %v561_v42 = vld [vmem:[#allocation5] sm:$0xf] }
  0x3a   : > { %v574_v41 = vor.u32 %v635_v38, %v571_v39  ;;  %v634_v43 = vld [vmem:[#allocation5 + $0x4] sm:$0xf0]  ;;  %v633_v44 = vld [vmem:[#allocation5 + $0x4] sm:$0xf]  ;;  %v563_v45 = vld [vmem:[#allocation5 + $0x8] sm:$0xf0] }
  0x3b   : > { %322 = vmatpush.bf16.msra.mxu0 %v602_v16  ;;  %v562_v46 = vor.u32 %v634_v43, %v561_v42  ;;  %v221_v47 = vld [vmem:[%s1011_s25] sm:$0xff]  ;;  %v222_v48 = vld [vmem:[%s1011_s25 + $0x8] sm:$0xff]  ;;  %v566_v49 = vor.u32 %v633_v44, %v563_v45  ;;  %s650_s18 = sshll.u32 %s928_s16, 4  ;;  %s211_s23 = scalar_lea.vmem [#allocation7], %s555_s11 }
  0x3c   : > { %336 = vmatpush.bf16.msra.mxu1 %v606_v17  ;;  %v223_v50 = vpack.c.bf16 %v222_v48, %v221_v47  ;;  %s412_s17 = scalar_lea.hbm %s1078_s2, %s650_s18  ;;  %s413_s21 = sshll.u32 %s211_s23, 4  ;;  %s1029_s21 = int_to_ptr.vmem [resolvable:$true] %s413_s21 }
  0x3d   : > { %s415_s22 = sshll.u32 %s412_s17, 4  ;;  %s395_s24 = scalar_lea.sflag [#allocation4], %s1005_s6  ;;  %s416_s22 = int_to_ptr.hbm [resolvable:$true] %s415_s22 }
  0x3e   : > { %s792_s29 = sshra.s32 %s416_s22, 4  ;;  %s798_s9 = scalar_lea.hbm %s1078_s2, 64  ;;  %s793_s29 = int_to_ptr.hbm [resolvable:$true] %s792_s29 }
  0x3f   : > { %323 = vmatpush.bf16.msra.mxu0 %v594_v22  ;;  %s794_s30 = scalar_lea.hbm %s793_s29, 16  ;;  %p799_p7 = scmp.lt.s32.totalorder %s793_s29, %s1078_s2 }
  0x40   : > { %337 = vmatpush.bf16.msra.mxu1 %v598_v23  ;;  %p795_p1 = scmp.ne.s32.totalorder %s793_s29, %s794_s30  ;;  %p800_p2 = scmp.lt.s32.totalorder %s798_s9, %s794_s30 }
  0x42   : > { %p796_p4 = pnand %p795_p1, %p975_p0  ;;  %p801_p9 = por %p800_p2, %p799_p7 }
  0x43   : > { %324 = vmatpush.bf16.msra.mxu0 %v586_v28 }
  0x44   : > { %338 = vmatpush.bf16.msra.mxu1 %v590_v29  ;;  %p797_p8 = pneg %p796_p4 }
  0x46   : > { %p802_p10 = pnand %p801_p9, %p797_p8 }
  0x47   : > { %325 = vmatpush.bf16.msra.mxu0 %v578_v34 }
  0x48   : > { %339 = vmatpush.bf16.msra.mxu1 %v582_v35 }
  0x4b   : > { %326 = vmatpush.bf16.msra.mxu0 %v570_v40 }
  0x4c   : > { %340 = vmatpush.bf16.msra.mxu1 %v574_v41 }
  0x4f   : > { %327 = vmatpush.bf16.msra.mxu0 %v562_v46 }
  0x50   : > { %341 = vmatpush.bf16.msra.mxu1 %v566_v49 }
  0x52   : > { %328 = vmatmul.bf16.vlgmr.msra.gmra.mxu0 %v223_v50 }
  0x53   : > { %342 = vmatmul.bf16.vlgmr.msra.gmra.mxu1 %v223_v50 }
  0xcf   : > { %v329_v51 = vpop.f32.mrf.mxu0 }
  0xd0   : > { %v343_v52 = vpop.f32.mrf.mxu1  ;;  %v366_v55 = vmul.f32 %v329_v51, %v329_v51 }
  0xd1   : > { %v348_v53 = vpack.c.bf16 %v343_v52, %v329_v51  ;;  %v367_v59 = vmul.f32 %v343_v52, %v343_v52 }
  0xd3   : > { %350 = vst [vmem:[%s211_s23] sm:$0xff] %v348_v53 }
  0xd7   : > { %v331_v54 = vpop.f32.mrf.mxu0 }
  0xd8   : > { %v352_v56 = vadd.f32 %v331_v54, %v329_v51  ;;  %v368_v57 = vmul.f32 %v331_v54, %v331_v54  ;;  %v345_v58 = vpop.f32.mrf.mxu1 }
  0xd9   : > { %v349_v60 = vpack.c.bf16 %v345_v58, %v331_v54  ;;  %v359_v61 = vadd.f32 %v345_v58, %v343_v52  ;;  %v369_v62 = vmul.f32 %v345_v58, %v345_v58 }
  0xda   : > { %v353_v63 = vrot.slane %v352_v56, 4  ;;  %v370_v0 = vadd.f32 %v368_v57, %v366_v55 }
  0xdb   : > { %351 = vst [vmem:[%s211_s23 + $0x8] sm:$0xff] %v349_v60  ;;  %v360_v1 = vrot.slane %v359_v61, 4  ;;  %v377_v2 = vadd.f32 %v369_v62, %v367_v59 }
  0xdc   : > { %v354_v3 = vadd.f32 %v353_v63, %v352_v56  ;;  %v371_v4 = vrot.slane %v370_v0, 4 }
  0xdd   : > { %805 = shalt.err (!%p802_p10)
}
  0xde   : > { %s885_s20 = smov 128   ;;  %s886_s25 = smov 8   ;;  %v361_v5 = vadd.f32 %v360_v1, %v359_v61  ;;  %v378_v6 = vrot.slane %v377_v2, 4  ;;  %v355_v7 = vrot.slane %v354_v3, 2  ;;  %v372_v8 = vadd.f32 %v371_v4, %v370_v0 }
  0xdf   : > { %658 = dma.vmem_to_hbm [thread:$0]  (%p975_p0), %s1029_s21, 256, %s416_s22, %s395_s24, %s885_s20, %s885_s20, %s886_s25   ;;  %vm384_vm0 = vcmask 1040384   ;;  %vm390_vm1 = vcmask 1041408  }
  0xe0   : > { %v362_v9 = vrot.slane %v361_v5, 2  ;;  %v379_v10 = vadd.f32 %v378_v6, %v377_v2  ;;  %v373_v11 = vrot.slane %v372_v8, 2  ;;  %v356_v12 = vadd.f32 %v355_v7, %v354_v3  ;;  %s558_s18 = sshll.u32 %s1005_s6, 2  ;;  %s651_s23 = sshll.u32 %s928_s16, 2 }
  0xe1   : > { %s429_s17 = scalar_lea.hbm %s1079_s3, %s651_s23  ;;  %s218_s21 = scalar_lea.vmem [#allocation8], %s558_s18 }
  0xe2   : > { %v363_v13 = vadd.f32 %v362_v9, %v361_v5  ;;  %v380_v14 = vrot.slane %v379_v10, 2  ;;  %v374_v15 = vadd.f32 %v373_v11, %v372_v8  ;;  %v357_v19 = vrot.slane %v356_v12, 1  ;;  %s431_s22 = sshll.u32 %s218_s21, 4  ;;  %s433_s24 = sshll.u32 %s429_s17, 4  ;;  %s432_s22 = int_to_ptr.vmem [resolvable:$true] %s431_s22  ;;  %s434_s24 = int_to_ptr.hbm [resolvable:$true] %s433_s24 }
  0xe3   : > { %s400_s16 = scalar_lea.sflag [#allocation9], %s1005_s6  ;;  %s820_s29 = sshra.s32 %s434_s24, 4  ;;  %s821_s29 = int_to_ptr.hbm [resolvable:$true] %s820_s29 }
  0xe4   : > { %v364_v16 = vrot.slane %v363_v13, 1  ;;  %v381_v17 = vadd.f32 %v380_v14, %v379_v10  ;;  %v375_v18 = vrot.slane %v374_v15, 1  ;;  %v358_v24 = vadd.f32 %v357_v19, %v356_v12  ;;  %s822_s30 = scalar_lea.hbm %s821_s29, 4  ;;  %s826_s9 = scalar_lea.hbm %s1079_s3, 16 }
  0xe5   : > { %p823_p11 = scmp.ne.s32.totalorder %s821_s29, %s822_s30  ;;  %p827_p3 = scmp.lt.s32.totalorder %s821_s29, %s1079_s3 }
  0xe6   : > { %v382_v20 = vrot.slane %v381_v17, 1  ;;  %v376_v21 = vadd.f32 %v375_v18, %v374_v15  ;;  %v365_v22 = vadd.f32 %v364_v16, %v363_v13  ;;  %p828_p5 = scmp.lt.s32.totalorder %s826_s9, %s822_s30 }
  0xe7   : > { %p824_p12 = pnand %p823_p11, %p975_p0 }
  0xe8   : > { %v383_v23 = vadd.f32 %v382_v20, %v381_v17  ;;  %v385_v27 = vsel %vm384_vm0, %v358_v24, %v376_v21  ;;  %p829_p1 = por %p828_p5, %p827_p3 }
  0xe9   : > { %p825_p13 = pneg %p824_p12 }
  0xea   : > { %v386_v25 = vsel %vm384_vm0, %v365_v22, %v383_v23 }
  0xeb   : > { %v389_v26 = vrot.slane %v386_v25, 6  ;;  %p830_p4 = pnand %p829_p1, %p825_p13 }
  0xed   : > { %v391_v28 = vsel %vm390_vm1, %v385_v27, %v389_v26 }
  0xee   : > { %393 = vst [vmem:[%s218_s21] sm:$0xf] %v391_v28 }
  0xef   : > { %833 = shalt.err (!%p830_p4)
}
  0xf0   : > { %659 = dma.vmem_to_hbm [thread:$0]  (%p975_p0), %s432_s22, 64, %s434_s24, %s400_s16  }
  0xf1 PF: > { %p680_p8 = scmp.ge.s32.totalorder %s880_s15, 2  ;;  %s445_s6 = sand.u32 1, %s868_s12  }
  0xf2   : > { %s446_s20 = scalar_lea.sflag [#allocation4], %s445_s6 }
  0xf3   : > { %p671_p7 = pnand %p680_p8, %p942_p6 }
  0xf5   : > { %p672_p2 = pneg %p671_p7 }
  0xf7   : > { %859 = dma.done.wait (%p672_p2), %s446_s20, 256  }
  0xf8   : > { %861 = vsyncadd (%p672_p2), %s446_s20, 4294967040  ;;  %s456_s25 = scalar_lea.sflag [#allocation9], %s445_s6 }
  0xf9   : > { %863 = dma.done.wait (%p672_p2), %s456_s25, 64  }
  0xfa   : > { %865 = vsyncadd (%p672_p2), %s456_s25, 4294967232  ;;  %p21_p0 = scmp.ge.s32.totalorder %s959_s26, 6   ;;  %s1085_s12 = smov %s872_s13 }
  0xfb   : > { %s1086_s13 = smov %s876_s14  ;;  %s1087_s14 = smov %s971_s4 }
  0xfc   : > { %s1088_s15 = smov %s959_s26  ;;  %23 = sbr.rel (!%p21_p0) target bundleno = 8 (0x8), region = 94 }
 0x101   :  { %462 = vsyncpa [#allocation3], 1 }
 0x102   :  { %464 = vsyncpa [#allocation3 + $0x1], 1 }
 0x103   :  { %465 = vsyncpa [#allocation6], 1 }
 0x104   :  { %466 = vsyncpa [#allocation4], 1 }
 0x105   :  { %468 = vsyncpa [#allocation4 + $0x1], 1 }
 0x106   :  { %469 = vsyncpa [#allocation9], 1 }
 0x107   :  { %471 = vsyncpa [#allocation9 + $0x1], 1 }

</bundles_post_ra>
